<compile_context>
chip_gen: v6e
topology: v6e:2x2x1
jax: 0.10.0
libtpu: 0.0.40
codegen_flags: <defaults>
</compile_context>

<pallas_src>
import jax
import jax.numpy as jnp
from jax import lax
from jax.experimental import pallas as pl
from jax.experimental.pallas import tpu as pltpu


def _round_up(x, m):
    return ((x + m - 1) // m) * m


def _vmem_capacity_bytes():
    """Physical VMEM of the current TPU generation (fallback: 64 MiB = v7x/TC)."""
    try:
        cap = getattr(pltpu.get_tpu_info(), "vmem_capacity_bytes", None)
        if cap:
            return int(cap)
    except Exception:
        pass
    return 64 << 20


def _mlp_proj_kernel(x_ref, w_ref, b_ref, o_ref):
    # x_ref: (C, TM)  channels-major activation tile (TM lane-dense)
    # w_ref: (C, N)   resident weight (= PyTorch weight.T)
    # b_ref: (1, N)   f32 bias row
    # o_ref: (TM, N)  token-major output tile
    acc = lax.dot_general(
        x_ref[...], w_ref[...],
        dimension_numbers=(((0,), (0,)), ((), ())),   # contract over channels
        preferred_element_type=jnp.float32,
    )
    o_ref[...] = (acc + b_ref[...].astype(jnp.float32)).astype(o_ref.dtype)


def _pick_tm(hw, c, n, in_item, out_item, tm_max, budget):
    """Largest multiple-of-128 token tile whose pipelined buffers fit `budget`."""
    fixed = 2 * (c * n * in_item + n * 4)              # resident weight + f32 bias
    per_tok = 3 * c * in_item + 2 * n * out_item       # x (<=3 bufs) + out (2 bufs)
    tm = max(budget - fixed, 0) // max(per_tok, 1)
    tm = max(128, min(tm_max, (tm // 128) * 128))
    if hw <= tm:
        return hw                                      # whole token row in one tile
    return tm


def mlp_proj(x_cm, weight, bias, *, compute_dtype=jnp.bfloat16,
             tm_max=None, vmem_budget=None):
    """Fused (flatten+transpose) + Linear.

    x_cm:   (B, C, HW) channels-major activations (native NCHW, just flattened)
    weight: (C, N)     transpose of the PyTorch nn.Linear weight
    bias:   (N,)
    returns (B, HW, N) == x.flatten(2).transpose(1, 2) @ weight + bias
    """
    B, C, HW = x_cm.shape
    C2, N = weight.shape
    assert C == C2

    # bf16 default: in production pass bf16 arrays so these casts are no-ops.
    x_cm = x_cm.astype(compute_dtype)
    weight = weight.astype(compute_dtype)
    b2d = bias.astype(jnp.float32).reshape(1, N)       # tiny; kept f32 for accuracy
    out_dtype = compute_dtype

    in_item = jnp.dtype(compute_dtype).itemsize
    out_item = jnp.dtype(out_dtype).itemsize

    # Generation-aware VMEM sizing.
    cap = _vmem_capacity_bytes()
    if vmem_budget is None:
        vmem_budget = int(0.55 * cap)
    if tm_max is None:
        tm_max = 4096 if cap >= (96 << 20) else 2048

    tm = _pick_tm(HW, C, N, in_item, out_item, tm_max, vmem_budget)

    # v7x has 2 TensorCores: guarantee >= 2 parallel grid steps when possible.
    if B * pl.cdiv(HW, tm) < 2 and HW > 128:
        tm = min(tm, _round_up(pl.cdiv(HW, 2), 128))

    grid = (B, pl.cdiv(HW, tm))

    # Pipelined VMEM actually needed (weight conservatively counted twice in
    # case the single-buffer hint is unavailable) + headroom for Mosaic scratch.
    vmem_needed = (3 * C * tm * in_item + 2 * tm * N * out_item
                   + 2 * C * N * in_item + 2 * N * 4)
    vmem_limit = int(min(max(vmem_needed + (8 << 20), 32 << 20), int(0.72 * cap)))

    cost = pl.CostEstimate(
        flops=2 * B * HW * C * N,
        transcendentals=0,
        bytes_accessed=(B * C * HW * in_item + C * N * in_item + N * 4
                        + B * HW * N * out_item),
    )

    def run(use_pipeline_hints):
        if use_pipeline_hints:
            x_spec = pl.BlockSpec((None, C, tm), lambda b, j: (b, 0, j),
                                  pipeline_mode=pl.Buffered(3))
            w_spec = pl.BlockSpec((C, N), lambda b, j: (0, 0),
                                  pipeline_mode=pl.Buffered(1))
            b_spec = pl.BlockSpec((1, N), lambda b, j: (0, 0),
                                  pipeline_mode=pl.Buffered(1))
        else:
            x_spec = pl.BlockSpec((None, C, tm), lambda b, j: (b, 0, j))
            w_spec = pl.BlockSpec((C, N), lambda b, j: (0, 0))
            b_spec = pl.BlockSpec((1, N), lambda b, j: (0, 0))
        return pl.pallas_call(
            _mlp_proj_kernel,
            out_shape=jax.ShapeDtypeStruct((B, HW, N), out_dtype),
            grid_spec=pltpu.PrefetchScalarGridSpec(
                num_scalar_prefetch=0,
                grid=grid,
                in_specs=[x_spec, w_spec, b_spec],
                out_specs=pl.BlockSpec((None, tm, N), lambda b, j: (b, j, 0)),
            ),
            compiler_params=pltpu.CompilerParams(
                dimension_semantics=("parallel", "parallel"),
                vmem_limit_bytes=vmem_limit,
            ),
            cost_estimate=cost,
        )(x_cm, weight, b2d)

    try:
        return run(True)
    except Exception:
        # pipeline_mode hints are perf-only; fall back to default buffering if
        # this JAX/Mosaic build rejects Buffered(1)/Buffered(3) on these specs.
        return run(False)


def mlp_forward(x_nchw, weight, bias, **kwargs):
    """Full module forward: (B, C, H, W) -> (B, H*W, embed_dim).

    weight: (C, embed_dim), i.e. transpose of the PyTorch nn.Linear weight.
    """
    B, C, H, W = x_nchw.shape
    x_cm = x_nchw.reshape(B, C, H * W)   # free reshape; transpose fused in-kernel
    return mlp_proj(x_cm, weight, bias, **kwargs)


if __name__ == "__main__":
    # Small shapes consistent with the module: input_dim = C = 4, embed_dim = 32.
    B, C, H, W = 2, 4, 16, 16
    embed_dim = 32

    key = jax.random.PRNGKey(0)
    kx, kw, kb = jax.random.split(key, 3)

    x = jax.random.normal(kx, (B, C, H, W), dtype=jnp.float32)
    # nn.Linear(input_dim, embed_dim): weight (embed_dim, input_dim), bias (embed_dim,)
    bound = 1.0 / (C ** 0.5)
    w_pt = jax.random.uniform(kw, (embed_dim, C), minval=-bound, maxval=bound,
                              dtype=jnp.float32)
    b_pt = jax.random.uniform(kb, (embed_dim,), minval=-bound, maxval=bound,
                              dtype=jnp.float32)
    weight = w_pt.T  # (C, embed_dim)

    # Default (bf16 I/O) path.
    out = mlp_forward(x, weight, b_pt)
    out = jax.block_until_ready(out)

    # Reference in plain JAX (same math as the PyTorch forward).
    x_tok = jnp.transpose(x.reshape(B, C, H * W), (0, 2, 1))
    ref = x_tok @ weight + b_pt
    # bf16-quantized-input reference for the default path.
    ref_q = (x_tok.astype(jnp.bfloat16).astype(jnp.float32)
             @ weight.astype(jnp.bfloat16).astype(jnp.float32)) + b_pt

    assert out.shape == (B, H * W, embed_dim)
    assert out.dtype == jnp.bfloat16
    assert jnp.allclose(out.astype(jnp.float32), ref_q, atol=2e-2, rtol=2e-2)

    # Exact-f32 path still matches the PyTorch module tightly.
    out_f32 = jax.block_until_ready(
        mlp_forward(x, weight, b_pt, compute_dtype=jnp.float32))
    assert out_f32.shape == (B, H * W, embed_dim)
    assert jnp.allclose(out_f32, ref, atol=1e-4, rtol=1e-4)

    print("KERNEL_OK")
</pallas_src>

<mosaic_0001>
module attributes {stable_mosaic.version = 11 : i64} {
  func.func @_mlp_proj_kernel(%arg0: i32, %arg1: i32, %arg2: memref<1x4x256xbf16, #tpu.memory_space<vmem>>, %arg3: memref<4x32xbf16, #tpu.memory_space<vmem>>, %arg4: memref<1x32xf32, #tpu.memory_space<vmem>>, %arg5: memref<1x256x32xbf16, #tpu.memory_space<vmem>>) attributes {dimension_semantics = [#tpu.dimension_semantics<parallel>, #tpu.dimension_semantics<parallel>], iteration_bounds = array<i64: 2, 1>, scalar_prefetch = 0 : i64, scratch_operands = 0 : i64, tpu.core_type = #tpu.core_type<tc>, window_params = [{transform_indices = @transform_0, window_bounds = array<i64: 1, 4, 256>}, {pipeline_mode = #tpu.pipeline_mode<synchronous>, transform_indices = @transform_1, window_bounds = array<i64: 4, 32>}, {pipeline_mode = #tpu.pipeline_mode<synchronous>, transform_indices = @transform_2, window_bounds = array<i64: 1, 32>}, {transform_indices = @transform_3, window_bounds = array<i64: 1, 256, 32>}]} {
    %c0 = arith.constant 0 : index
    %c0_0 = arith.constant 0 : index
    %c0_1 = arith.constant 0 : index
    %0 = vector.load %arg2[%c0, %c0_0, %c0_1] : memref<1x4x256xbf16, #tpu.memory_space<vmem>>, vector<1x4x256xbf16>
    %1 = vector.shape_cast %0 : vector<1x4x256xbf16> to vector<4x256xbf16>
    %c0_2 = arith.constant 0 : index
    %c0_3 = arith.constant 0 : index
    %2 = vector.load %arg3[%c0_2, %c0_3] : memref<4x32xbf16, #tpu.memory_space<vmem>>, vector<4x32xbf16>
    %cst = arith.constant dense<0.000000e+00> : vector<256x32xf32>
    %3 = tpu.matmul %1, %2, %cst {dimension_numbers = #tpu.dot_dimension_numbers<[0], [0], [1], [1], [0, 1, 1, 1], [], []>} : vector<4x256xbf16>, vector<4x32xbf16>, vector<256x32xf32> -> vector<256x32xf32>
    %c0_4 = arith.constant 0 : index
    %c0_5 = arith.constant 0 : index
    %4 = vector.load %arg4[%c0_4, %c0_5] : memref<1x32xf32, #tpu.memory_space<vmem>>, vector<1x32xf32>
    %5 = vector.broadcast %4 : vector<1x32xf32> to vector<256x32xf32>
    %6 = arith.addf %3, %5 : vector<256x32xf32>
    %7 = arith.truncf %6 : vector<256x32xf32> to vector<256x32xbf16>
    %c0_6 = arith.constant 0 : index
    %c0_7 = arith.constant 0 : index
    %c0_8 = arith.constant 0 : index
    %8 = vector.load %arg5[%c0_6, %c0_7, %c0_8] : memref<1x256x32xbf16, #tpu.memory_space<vmem>>, vector<1x256x32xbf16>
    %9 = vector.shape_cast %8 : vector<1x256x32xbf16> to vector<256x32xbf16>
    %10 = vector.shape_cast %7 : vector<256x32xbf16> to vector<1x256x32xbf16>
    tpu.vector_store %arg5[%c0_6, %c0_7, %c0_8], %10 {strides = array<i32>} : memref<1x256x32xbf16, #tpu.memory_space<vmem>>, vector<1x256x32xbf16>,
    return
  }
  func.func @transform_0(%arg0: i32, %arg1: i32) -> (i32, i32, i32) {
    %c0_i32 = arith.constant 0 : i32
    %c0_i32_0 = arith.constant 0 : i32
    return %arg0, %c0_i32, %arg1 : i32, i32, i32
  }
  func.func @transform_1(%arg0: i32, %arg1: i32) -> (i32, i32) {
    %c0_i32 = arith.constant 0 : i32
    %c0_i32_0 = arith.constant 0 : i32
    %c0_i32_1 = arith.constant 0 : i32
    return %c0_i32, %c0_i32_0 : i32, i32
  }
  func.func @transform_2(%arg0: i32, %arg1: i32) -> (i32, i32) {
    %c0_i32 = arith.constant 0 : i32
    %c0_i32_0 = arith.constant 0 : i32
    %c0_i32_1 = arith.constant 0 : i32
    return %c0_i32, %c0_i32_0 : i32, i32
  }
  func.func @transform_3(%arg0: i32, %arg1: i32) -> (i32, i32, i32) {
    %c0_i32 = arith.constant 0 : i32
    %c0_i32_0 = arith.constant 0 : i32
    return %arg0, %arg1, %c0_i32 : i32, i32, i32
  }
}

</mosaic_0001>

<bundles_post_ra>
// kernel: tpu_custom_call.1
= control target key start
LH: loop header
LB: loop body
LE: loop exit
PB: predicated region body
PF: predicated region fallthrough
CT: control target
= control target key end

     0   :  { %8 = vsyncpa [#allocation3], 0  ;;  %s1356_s0 = inlined_call_operand.hbm [shape: bf16[2,4,256], index: 0, kind: input, shape index: {}]   ;;  %s1357_s1 = inlined_call_operand.hbm [shape: bf16[4,32], index: 1, kind: input, shape index: {}]   ;;  %s1358_s2 = inlined_call_operand.vmem [shape: f32[1,32], index: 2, kind: input, shape index: {}]   ;;  %s1359_s3 = inlined_call_operand.vmem [shape: bf16[2,256,32], index: 3, kind: output, shape index: {}]  }
   0x1   :  { %10 = vsyncpa [#allocation3 + $0x1], 0 }
   0x2   :  { %11 = vsyncpa [#allocation5], 0  ;;  %s1116_s12 = smov 0   ;;  %s1118_s13 = smov 0  }
   0x3   :  { %s1120_s14 = smov 0   ;;  %s1122_s15 = smov 0  }
   0x4   :  { %s1124_s16 = smov 0   ;;  %s1126_s17 = smov 0  }
   0x5 LB: > { %s763_s18 = sadd.s32 4294967295, %s1092_s17   ;;  %p51_p0 = scmp.ne.s32.totalorder %s1076_s13, %s1072_s12  ;;  %s1092_s17 = sphi %s1126_s17, %s17_s17   ;;  %s1088_s16 = sphi %s1124_s16, %s1369_s16   ;;  %s1084_s15 = sphi %s1122_s15, %s1368_s15   ;;  %s1080_s14 = sphi %s1120_s14, %s1367_s14   ;;  %s1076_s13 = sphi %s1118_s13, %s1366_s13   ;;  %s1072_s12 = sphi %s1116_s12, %s1365_s12  }
   0x6   : > { %p1146_p1 = scmp.eq.s32.totalorder %s763_s18, 0  ;;  %p765_p2 = scmp.ge.s32.totalorder %s1092_s17, 1 }
   0x7   : > { %p132_p3 = scmp.lt.s32.totalorder %s1092_s17, 3  ;;  %s1094_s22 = smov [#allocation4]  }
   0x8   : > { %p1154_p4 = por %p1146_p1, %p51_p0  ;;  %s145_s23 = sshll.u32 %s1094_s22, 4  ;;  %s146_s23 = int_to_ptr.vmem [resolvable:$true] %s145_s23 }
   0x9   : > { %p1158_p5 = pnand %p765_p2, %p132_p3  ;;  %s29_s25 = sadd.s32 1, %s1088_s16 }
   0xa   : > { %s38_s26 = sadd.s32 1, %s1080_s14  ;;  %p31_p8 = scmp.ge.s32.totalorder %s29_s25, 2 }
   0xb   : > { %p923_p6 = pneg %p1158_p5  ;;  %s995_s27 = scalar_lea.vmem %s146_s23, 32 }
   0xc   : > { %p996_p10 = scmp.ne.s32.totalorder %s146_s23, %s995_s27  ;;  %p1003_p13 = scmp.lt.s32.totalorder %s146_s23, %s146_s23 }
   0xd   : > { %p1166_p7 = pnand %p923_p6, %p1146_p1  ;;  %p1004_p0 = scmp.lt.s32.totalorder %s995_s27, %s995_s27 }
   0xf   : > { %p986_p9 = pneg %p1166_p7  ;;  %p1005_p2 = por %p1004_p0, %p1003_p13 }
  0x11   : > { %p998_p11 = pnand %p996_p10, %p986_p9 }
  0x13   : > { %p999_p12 = pneg %p998_p11 }
  0x15   : > { %p1006_p3 = pnand %p1005_p2, %p999_p12 }
  0x17   : > { %1009 = shalt.err (!%p1006_p3)
}
  0x18   : > { %926 = dma.hbm_to_vmem [thread:$0]  (!%p1166_p7), %s1357_s1, 32, %s146_s23, [#allocation5]  }
  0x19   : > { %s1371_s25 = smov (%p31_p8, %s29_s25), 0  ;;  %p45_p6 = scmp.ne.s32.totalorder %s1080_s14, %s1076_s13 }
  0x1a   : > { %p46_p9 = scmp.eq.s32.totalorder %s1092_s17, 0  ;;  %s33_s30 = ssub.s32 %s1088_s16, %s1371_s25 }
  0x1b   : > { %p932_p10 = scmp.lt.s32.totalorder %s1092_s17, 2  ;;  %p36_p11 = scmp.eq.s32.totalorder %s33_s30, 0 }
  0x1c   : > { %p47_p12 = por %p46_p9, %p45_p6  ;;  %s159_s4 = sand.u32 1, %s1080_s14  }
  0x1d   : > { %s828_s5 = sshll.u32 %s1088_s16, 6  ;;  %s768_s7 = sshll.u32 %s159_s4, 2 }
  0x1e   : > { %s1190_s6 = scalar_select %p36_p11, %s1080_s14, %s38_s26  }
  0x1f   : > { %s171_s10 = scalar_lea.hbm %s1356_s0, %s828_s5  ;;  %s163_s11 = scalar_lea.vmem [#allocation2], %s768_s7 }
  0x20   : > { %s173_s12 = sshll.u32 %s163_s11, 4  ;;  %p1195_p7 = pnand %p932_p10, %p47_p12  ;;  %s174_s12 = int_to_ptr.vmem [resolvable:$true] %s173_s12 }
  0x21   : > { %s160_s22 = scalar_lea.sflag [#allocation3], %s159_s4  ;;  %s1023_s23 = scalar_lea.vmem %s174_s12, 64 }
  0x22   : > { %p1012_p8 = pneg %p1195_p7  ;;  %p1024_p13 = scmp.ne.s32.totalorder %s174_s12, %s1023_s23 }
  0x23   : > { %s1095_s24 = smov [#allocation2]  }
  0x24   : > { %p1026_p0 = pnand %p1024_p13, %p1012_p8  ;;  %s1028_s26 = sshll.u32 %s1095_s24, 4  ;;  %s1029_s26 = int_to_ptr.vmem [resolvable:$false] %s1028_s26 }
  0x25   : > { %s1030_s27 = scalar_lea.vmem %s1029_s26, 128  ;;  %p1031_p3 = scmp.lt.s32.totalorder %s174_s12, %s1029_s26 }
  0x26   : > { %p1027_p2 = pneg %p1026_p0  ;;  %p1032_p6 = scmp.lt.s32.totalorder %s1030_s27, %s1023_s23 }
  0x28   : > { %p1033_p9 = por %p1032_p6, %p1031_p3 }
  0x2a   : > { %p1034_p10 = pnand %p1033_p9, %p1027_p2 }
  0x2c   : > { %1037 = shalt.err (!%p1034_p10)
}
  0x2d   : > { %930 = dma.hbm_to_vmem [thread:$0]  (!%p1195_p7), %s171_s10, 64, %s174_s12, %s160_s22  }
  0x2e   : > { %182 = sbr.rel (%p1158_p5) target bundleno = 419 (0x1a3), region = 32  ;;  %s184_s28 = sand.u32 (!%p1158_p5), 1, %s1076_s13  }
  0x2f   : > { %s772_s29 = sshll.u32 (!%p1158_p5), %s184_s28, 2  ;;  %s185_s30 = scalar_lea.sflag (!%p1158_p5), [#allocation3], %s184_s28 }
  0x30   : > { %s188_s4 = scalar_lea.vmem (!%p1158_p5), [#allocation2], %s772_s29 }
  0x33   : > { %1063 = dma.done.wait (%p1154_p4), %s185_s30, 64  }
  0x34   : > { %1065 = vsyncadd (%p1154_p4), %s185_s30, 4294967232 }
  0x35   : > { %1067 = dma.done.wait (%p1146_p1), [#allocation5], 32  }
  0x36   : > { %1069 = vsyncadd (%p1146_p1), [#allocation5], 4294967264  ;;  %vm332_vm0 = vcmask 1041408   ;;  %v232_v1 = vld [vmem:[#allocation4] sm:$0x3]  ;;  %vm283_vm1 = vcmask 31744  }
  0x37   : > { %v777_v0 = vld.sshfl [vmem:[%s188_s4] sm:$0x33 pattern:$0x76325410]  ;;  %915 = vmatprep.subr.msk.bf16.mxu0 %vm332_vm0, %v232_v1  ;;  %v334_v2 = vsel %vm332_vm0, %v232_v1, 0  ;;  %916 = vmatprep.subr.msk.bf16.mxu1 %vm332_vm0, %v232_v1  ;;  %p221_p1 = scmp.lt.s32.totalorder %s1084_s15, 1 }
  0x38   : > { %251 = vxpose.xlu0.c.b16.start.end [1/1] (short) %v777_v0, 128  ;;  %880 = vmatpush3.bf16.msra.mxu0 %v334_v2  ;;  %v248_v3 = vcombine.high %v777_v0, %v777_v0  ;;  %v1235_v20 = vld [vmem:[%s1358_s2] ss:$0 sm:$0xff]  ;;  %vm625_vm2 = vcmask 257024  }
  0x39   : > { %914 = vmatpush3.bf16.msra.mxu1 %v334_v2  ;;  %s1373_s15 = smov (!%p221_p1, %s1084_s15), 1 }
  0x3a   : > { %s829_s21 = sshll.u32 %s1373_s15, 7 }
  0x3b   : > { %s1241_s8 = scalar_lea.vmem %s1359_s3, %s829_s21 }
  0x55   : > { %267 = vxpose.xlu0.c.b16.start.end [1/1] (short) %v248_v3, 128 }
  0x9a   : > { %v259_v4 = vpop.trf.xlu0 }
  0x9b   : > { %881 = vmatprep.mubr.msk.bf16.mxu0 %vm283_vm1, %v259_v4 }
  0x9e   : > { %v260_v5 = vpop.trf.xlu0 }
  0x9f   : > { %882 = vmatmul.mubr.msk.bf16.vlgmr.msra.gmra.mxu0 %vm283_vm1, %v260_v5 }
  0xa2   : > { %v261_v6 = vpop.trf.xlu0 }
  0xa3   : > { %885 = vmatprep.mubr.msk.bf16.mxu0 %vm283_vm1, %v261_v6 }
  0xa6   : > { %v262_v7 = vpop.trf.xlu0 }
  0xa7   : > { %886 = vmatmul.mubr.msk.bf16.gmra.mxu0 %vm283_vm1, %v262_v7 }
  0xaa   : > { %v263_v8 = vpop.trf.xlu0 }
  0xab   : > { %889 = vmatprep.mubr.msk.bf16.mxu0 %vm283_vm1, %v263_v8 }
  0xae   : > { %v264_v9 = vpop.trf.xlu0 }
  0xaf   : > { %890 = vmatmul.mubr.msk.bf16.gmra.mxu0 %vm283_vm1, %v264_v9 }
  0xb2   : > { %v265_v10 = vpop.trf.xlu0 }
  0xb3   : > { %893 = vmatprep.mubr.msk.bf16.mxu0 %vm283_vm1, %v265_v10 }
  0xb6   : > { %v266_v11 = vpop.trf.xlu0 }
  0xb7   : > { %894 = vmatmul.mubr.msk.bf16.gmra.mxu0 %vm283_vm1, %v266_v11 }
  0xba   : > { %v275_v12 = vpop.trf.xlu0 }
  0xbb   : > { %897 = vmatprep.mubr.msk.bf16.mxu1 %vm283_vm1, %v275_v12 }
  0xbe   : > { %v276_v13 = vpop.trf.xlu0 }
  0xbf   : > { %898 = vmatmul.mubr.msk.bf16.vlgmr.msra.gmra.mxu1 %vm283_vm1, %v276_v13 }
  0xc2   : > { %v277_v14 = vpop.trf.xlu0 }
  0xc3   : > { %901 = vmatprep.mubr.msk.bf16.mxu1 %vm283_vm1, %v277_v14 }
  0xc6   : > { %v278_v15 = vpop.trf.xlu0 }
  0xc7   : > { %902 = vmatmul.mubr.msk.bf16.gmra.mxu1 %vm283_vm1, %v278_v15 }
  0xca   : > { %v279_v16 = vpop.trf.xlu0 }
  0xcb   : > { %905 = vmatprep.mubr.msk.bf16.mxu1 %vm283_vm1, %v279_v16 }
  0xce   : > { %v280_v17 = vpop.trf.xlu0 }
  0xcf   : > { %906 = vmatmul.mubr.msk.bf16.gmra.mxu1 %vm283_vm1, %v280_v17 }
  0xd2   : > { %v281_v18 = vpop.trf.xlu0 }
  0xd3   : > { %909 = vmatprep.mubr.msk.bf16.mxu1 %vm283_vm1, %v281_v18 }
  0xd6   : > { %v282_v19 = vpop.trf.xlu0 }
  0xd7   : > { %910 = vmatmul.mubr.msk.bf16.gmra.mxu1 %vm283_vm1, %v282_v19 }
 0x15f   : > { %v883_v21 = vpop.f32.mrf.mxu0 }
 0x160   : > { %v379_v22 = vadd.f32 %v883_v21, %v1235_v20 }
 0x161   : > { %v370_v23 = vpop.f32.mrf.mxu0 }
 0x162   : > { %v832_v24 = vpack.c.bf16 %v379_v22, %v379_v22  ;;  %v371_v25 = vadd.f32 %v1235_v20, %v370_v23 }
 0x163   : > { %v884_v26 = vpop.f32.mrf.mxu0 }
 0x164   : > { %628 = vst.msk [vmem:[%s1241_s8 + $0x8] sm:$0xf] %vm625_vm2, %v832_v24  ;;  %v830_v27 = vpack.c.bf16 %v371_v25, %v371_v25  ;;  %v382_v28 = vadd.f32 %v884_v26, %v1235_v20 }
 0x165   : > { %v373_v29 = vpop.f32.mrf.mxu0 }
 0x166   : > { %626 = vst.msk [vmem:[%s1241_s8] sm:$0xf] %vm625_vm2, %v830_v27  ;;  %v833_v30 = vpack.c.bf16 %v382_v28, %v382_v28  ;;  %v374_v31 = vadd.f32 %v1235_v20, %v373_v29 }
 0x167   : > { %v887_v32 = vpop.f32.mrf.mxu0 }
 0x168   : > { %629 = vst.msk [vmem:[%s1241_s8 + $0xc] sm:$0xf] %vm625_vm2, %v833_v30  ;;  %v831_v33 = vpack.c.bf16 %v374_v31, %v374_v31  ;;  %v395_v34 = vadd.f32 %v887_v32, %v1235_v20 }
 0x169   : > { %v386_v35 = vpop.f32.mrf.mxu0 }
 0x16a   : > { %627 = vst.msk [vmem:[%s1241_s8 + $0x4] sm:$0xf] %vm625_vm2, %v831_v33  ;;  %v836_v36 = vpack.c.bf16 %v395_v34, %v395_v34  ;;  %v387_v37 = vadd.f32 %v1235_v20, %v386_v35 }
 0x16b   : > { %v888_v38 = vpop.f32.mrf.mxu0 }
 0x16c   : > { %632 = vst.msk [vmem:[%s1241_s8 + $0x18] sm:$0xf] %vm625_vm2, %v836_v36  ;;  %v834_v39 = vpack.c.bf16 %v387_v37, %v387_v37  ;;  %v398_v40 = vadd.f32 %v888_v38, %v1235_v20 }
 0x16d   : > { %v389_v41 = vpop.f32.mrf.mxu0 }
 0x16e   : > { %630 = vst.msk [vmem:[%s1241_s8 + $0x10] sm:$0xf] %vm625_vm2, %v834_v39  ;;  %v837_v42 = vpack.c.bf16 %v398_v40, %v398_v40  ;;  %v390_v43 = vadd.f32 %v1235_v20, %v389_v41 }
 0x16f   : > { %v891_v44 = vpop.f32.mrf.mxu0 }
 0x170   : > { %633 = vst.msk [vmem:[%s1241_s8 + $0x1c] sm:$0xf] %vm625_vm2, %v837_v42  ;;  %v835_v45 = vpack.c.bf16 %v390_v43, %v390_v43  ;;  %v411_v46 = vadd.f32 %v891_v44, %v1235_v20 }
 0x171   : > { %v402_v47 = vpop.f32.mrf.mxu0 }
 0x172   : > { %631 = vst.msk [vmem:[%s1241_s8 + $0x14] sm:$0xf] %vm625_vm2, %v835_v45  ;;  %v840_v48 = vpack.c.bf16 %v411_v46, %v411_v46  ;;  %v403_v49 = vadd.f32 %v1235_v20, %v402_v47 }
 0x173   : > { %v892_v50 = vpop.f32.mrf.mxu0 }
 0x174   : > { %636 = vst.msk [vmem:[%s1241_s8 + $0x28] sm:$0xf] %vm625_vm2, %v840_v48  ;;  %v838_v51 = vpack.c.bf16 %v403_v49, %v403_v49  ;;  %v414_v52 = vadd.f32 %v892_v50, %v1235_v20 }
 0x175   : > { %v405_v53 = vpop.f32.mrf.mxu0 }
 0x176   : > { %634 = vst.msk [vmem:[%s1241_s8 + $0x20] sm:$0xf] %vm625_vm2, %v838_v51  ;;  %v841_v54 = vpack.c.bf16 %v414_v52, %v414_v52  ;;  %v406_v55 = vadd.f32 %v1235_v20, %v405_v53 }
 0x177   : > { %v895_v56 = vpop.f32.mrf.mxu0 }
 0x178   : > { %637 = vst.msk [vmem:[%s1241_s8 + $0x2c] sm:$0xf] %vm625_vm2, %v841_v54  ;;  %v839_v57 = vpack.c.bf16 %v406_v55, %v406_v55  ;;  %v427_v58 = vadd.f32 %v895_v56, %v1235_v20 }
 0x179   : > { %v418_v59 = vpop.f32.mrf.mxu0 }
 0x17a   : > { %635 = vst.msk [vmem:[%s1241_s8 + $0x24] sm:$0xf] %vm625_vm2, %v839_v57  ;;  %v844_v60 = vpack.c.bf16 %v427_v58, %v427_v58  ;;  %v419_v61 = vadd.f32 %v1235_v20, %v418_v59 }
 0x17b   : > { %v896_v62 = vpop.f32.mrf.mxu0 }
 0x17c   : > { %640 = vst.msk [vmem:[%s1241_s8 + $0x38] sm:$0xf] %vm625_vm2, %v844_v60  ;;  %v842_v63 = vpack.c.bf16 %v419_v61, %v419_v61  ;;  %v430_v0 = vadd.f32 %v896_v62, %v1235_v20 }
 0x17d   : > { %v421_v1 = vpop.f32.mrf.mxu0 }
 0x17e   : > { %638 = vst.msk [vmem:[%s1241_s8 + $0x30] sm:$0xf] %vm625_vm2, %v842_v63  ;;  %v845_v2 = vpack.c.bf16 %v430_v0, %v430_v0  ;;  %v422_v3 = vadd.f32 %v1235_v20, %v421_v1 }
 0x17f   : > { %v899_v4 = vpop.f32.mrf.mxu1 }
 0x180   : > { %641 = vst.msk [vmem:[%s1241_s8 + $0x3c] sm:$0xf] %vm625_vm2, %v845_v2  ;;  %v843_v5 = vpack.c.bf16 %v422_v3, %v422_v3  ;;  %v443_v6 = vadd.f32 %v899_v4, %v1235_v20 }
 0x181   : > { %v434_v7 = vpop.f32.mrf.mxu1 }
 0x182   : > { %639 = vst.msk [vmem:[%s1241_s8 + $0x34] sm:$0xf] %vm625_vm2, %v843_v5  ;;  %v848_v8 = vpack.c.bf16 %v443_v6, %v443_v6  ;;  %v435_v9 = vadd.f32 %v1235_v20, %v434_v7 }
 0x183   : > { %v900_v10 = vpop.f32.mrf.mxu1 }
 0x184   : > { %644 = vst.msk [vmem:[%s1241_s8 + $0x48] sm:$0xf] %vm625_vm2, %v848_v8  ;;  %v846_v11 = vpack.c.bf16 %v435_v9, %v435_v9  ;;  %v446_v12 = vadd.f32 %v900_v10, %v1235_v20 }
 0x185   : > { %v437_v13 = vpop.f32.mrf.mxu1 }
 0x186   : > { %642 = vst.msk [vmem:[%s1241_s8 + $0x40] sm:$0xf] %vm625_vm2, %v846_v11  ;;  %v849_v14 = vpack.c.bf16 %v446_v12, %v446_v12  ;;  %v438_v15 = vadd.f32 %v1235_v20, %v437_v13 }
 0x187   : > { %v903_v16 = vpop.f32.mrf.mxu1 }
 0x188   : > { %645 = vst.msk [vmem:[%s1241_s8 + $0x4c] sm:$0xf] %vm625_vm2, %v849_v14  ;;  %v847_v17 = vpack.c.bf16 %v438_v15, %v438_v15  ;;  %v459_v18 = vadd.f32 %v903_v16, %v1235_v20 }
 0x189   : > { %v450_v19 = vpop.f32.mrf.mxu1 }
 0x18a   : > { %643 = vst.msk [vmem:[%s1241_s8 + $0x44] sm:$0xf] %vm625_vm2, %v847_v17  ;;  %v852_v21 = vpack.c.bf16 %v459_v18, %v459_v18  ;;  %v451_v22 = vadd.f32 %v1235_v20, %v450_v19 }
 0x18b   : > { %v904_v23 = vpop.f32.mrf.mxu1 }
 0x18c   : > { %648 = vst.msk [vmem:[%s1241_s8 + $0x58] sm:$0xf] %vm625_vm2, %v852_v21  ;;  %v850_v24 = vpack.c.bf16 %v451_v22, %v451_v22  ;;  %v462_v25 = vadd.f32 %v904_v23, %v1235_v20 }
 0x18d   : > { %v453_v26 = vpop.f32.mrf.mxu1 }
 0x18e   : > { %646 = vst.msk [vmem:[%s1241_s8 + $0x50] sm:$0xf] %vm625_vm2, %v850_v24  ;;  %v853_v27 = vpack.c.bf16 %v462_v25, %v462_v25  ;;  %v454_v28 = vadd.f32 %v1235_v20, %v453_v26 }
 0x18f   : > { %v907_v29 = vpop.f32.mrf.mxu1 }
 0x190   : > { %649 = vst.msk [vmem:[%s1241_s8 + $0x5c] sm:$0xf] %vm625_vm2, %v853_v27  ;;  %v851_v30 = vpack.c.bf16 %v454_v28, %v454_v28  ;;  %v475_v31 = vadd.f32 %v907_v29, %v1235_v20 }
 0x191   : > { %v466_v32 = vpop.f32.mrf.mxu1 }
 0x192   : > { %647 = vst.msk [vmem:[%s1241_s8 + $0x54] sm:$0xf] %vm625_vm2, %v851_v30  ;;  %v856_v33 = vpack.c.bf16 %v475_v31, %v475_v31  ;;  %v467_v34 = vadd.f32 %v1235_v20, %v466_v32 }
 0x193   : > { %v908_v35 = vpop.f32.mrf.mxu1 }
 0x194   : > { %652 = vst.msk [vmem:[%s1241_s8 + $0x68] sm:$0xf] %vm625_vm2, %v856_v33  ;;  %v854_v36 = vpack.c.bf16 %v467_v34, %v467_v34  ;;  %v478_v37 = vadd.f32 %v908_v35, %v1235_v20 }
 0x195   : > { %v469_v38 = vpop.f32.mrf.mxu1 }
 0x196   : > { %650 = vst.msk [vmem:[%s1241_s8 + $0x60] sm:$0xf] %vm625_vm2, %v854_v36  ;;  %v857_v39 = vpack.c.bf16 %v478_v37, %v478_v37  ;;  %v470_v40 = vadd.f32 %v1235_v20, %v469_v38 }
 0x197   : > { %v911_v41 = vpop.f32.mrf.mxu1 }
 0x198   : > { %653 = vst.msk [vmem:[%s1241_s8 + $0x6c] sm:$0xf] %vm625_vm2, %v857_v39  ;;  %v855_v42 = vpack.c.bf16 %v470_v40, %v470_v40  ;;  %v491_v43 = vadd.f32 %v911_v41, %v1235_v20 }
 0x199   : > { %v482_v44 = vpop.f32.mrf.mxu1 }
 0x19a   : > { %651 = vst.msk [vmem:[%s1241_s8 + $0x64] sm:$0xf] %vm625_vm2, %v855_v42  ;;  %v860_v45 = vpack.c.bf16 %v491_v43, %v491_v43  ;;  %v483_v46 = vadd.f32 %v1235_v20, %v482_v44 }
 0x19b   : > { %v912_v47 = vpop.f32.mrf.mxu1 }
 0x19c   : > { %656 = vst.msk [vmem:[%s1241_s8 + $0x78] sm:$0xf] %vm625_vm2, %v860_v45  ;;  %v858_v48 = vpack.c.bf16 %v483_v46, %v483_v46  ;;  %v494_v49 = vadd.f32 %v912_v47, %v1235_v20 }
 0x19d   : > { %v485_v50 = vpop.f32.mrf.mxu1 }
 0x19e   : > { %654 = vst.msk [vmem:[%s1241_s8 + $0x70] sm:$0xf] %vm625_vm2, %v858_v48  ;;  %v861_v51 = vpack.c.bf16 %v494_v49, %v494_v49  ;;  %v486_v52 = vadd.f32 %v1235_v20, %v485_v50 }
 0x1a0   : > { %657 = vst.msk [vmem:[%s1241_s8 + $0x7c] sm:$0xf] %vm625_vm2, %v861_v51  ;;  %v859_v53 = vpack.c.bf16 %v486_v52, %v486_v52 }
 0x1a2   : > { %655 = vst.msk [vmem:[%s1241_s8 + $0x74] sm:$0xf] %vm625_vm2, %v859_v53 }
 0x1a3 PF: > { %s17_s17 = sadd.s32 1, %s1092_s17   ;;  %s1365_s12 = smov %s1076_s13 }
 0x1a4   : > { %p14_p4 = scmp.ge.s32.totalorder %s17_s17, 4   ;;  %s1366_s13 = smov %s1080_s14 }
 0x1a5   : > { %s1367_s14 = smov %s1190_s6  ;;  %s1368_s15 = smov %s1088_s16 }
 0x1a6   : > { %s1369_s16 = smov %s1371_s25  ;;  %16 = sbr.rel (!%p14_p4) target bundleno = 5 (0x5), region = 76 }
 0x1ab   :  { %688 = vsyncpa [#allocation3], 1 }
 0x1ac   :  { %690 = vsyncpa [#allocation3 + $0x1], 1 }
 0x1ad   :  { %691 = vsyncpa [#allocation5], 1 }

</bundles_post_ra>
